<compile_context>
chip_gen: v6e
topology: v6e:2x2x1
jax: 0.10.0
libtpu: 0.0.40
codegen_flags: <defaults>
</compile_context>

<pallas_src>
import jax
import jax.numpy as jnp
from jax.experimental import pallas as pl
from jax.experimental.pallas import tpu as pltpu


# ----------------------------- Pallas kernel -------------------------------


def _fused_clip_kernel(pooled_ref, cls_ref, wc_ref, bc_ref, wt_ref, bt_ref,
                       codex_out_ref, text_out_ref):
    # codex branch: (TM, Kp)bf16 @ (Kp, N)bf16 -> f32 MXU accumulate, + f32 bias
    codex_out_ref[...] = (
        jnp.dot(pooled_ref[...], wc_ref[...], preferred_element_type=jnp.float32)
        + bc_ref[...]
    )
    # text branch: (TM, Dt)bf16 @ (Dt, N)bf16 -> f32 MXU accumulate, + f32 bias
    text_out_ref[...] = (
        jnp.dot(cls_ref[...], wt_ref[...], preferred_element_type=jnp.float32)
        + bt_ref[...]
    )


def pallas_fused_projections(pooled, cls, w_codex_fused, b_codex_fused,
                             w_text, b_text, *, row_tile=128):
    """Single-launch fused codex/text projections.

    pooled:         (B, Kp)  bf16   mean-pooled flattened patches
    cls:            (B, Dt)  bf16   text CLS vectors
    w_codex_fused:  (Kp, N)  bf16   (wp @ w_codex_proj, folded offline)
    b_codex_fused:  (N,)     f32
    w_text:         (Dt, N)  bf16
    b_text:         (N,)     f32
    returns         (B, N) f32 codex features, (B, N) f32 text features
    """
    B, Kp = pooled.shape
    Dt = cls.shape[1]
    N = w_codex_fused.shape[1]

    # Row (batch) tile: at least 16 rows (bf16 sublane packing / MXU M-dim),
    # at most `row_tile` rows so the pipelined activation/output slabs stay
    # small next to the resident weights (fits v7x's 64 MiB VMEM).
    tm = min(row_tile, 16 * pl.cdiv(B, 16))
    b_pad = tm * pl.cdiv(B, tm)
    if b_pad != B:
        pad = ((0, b_pad - B), (0, 0))
        pooled = jnp.pad(pooled, pad)
        cls = jnp.pad(cls, pad)

    grid = (b_pad // tm,)

    flops = 2 * b_pad * Kp * N + 2 * b_pad * Dt * N
    bytes_accessed = (
        pooled.size * 2 + cls.size * 2
        + w_codex_fused.size * 2 + w_text.size * 2
        + b_codex_fused.size * 4 + b_text.size * 4
        + 2 * b_pad * N * 4
    )

    # Weights / biases: whole-array VMEM operands — single buffer, resident
    # across every row-tile grid step (no per-step re-DMA, no double buffer).
    resident_vmem = pl.BlockSpec(memory_space=pltpu.MemorySpace.VMEM)

    codex_out, text_out = pl.pallas_call(
        _fused_clip_kernel,
        out_shape=(
            jax.ShapeDtypeStruct((b_pad, N), jnp.float32),
            jax.ShapeDtypeStruct((b_pad, N), jnp.float32),
        ),
        grid=grid,
        in_specs=[
            pl.BlockSpec((tm, Kp), lambda i: (i, 0)),   # pooled rows (pipelined)
            pl.BlockSpec((tm, Dt), lambda i: (i, 0)),   # cls rows    (pipelined)
            resident_vmem,                              # w_codex_fused
            resident_vmem,                              # b_codex_fused
            resident_vmem,                              # w_text
            resident_vmem,                              # b_text
        ],
        out_specs=(
            pl.BlockSpec((tm, N), lambda i: (i, 0)),
            pl.BlockSpec((tm, N), lambda i: (i, 0)),
        ),
        compiler_params=pltpu.CompilerParams(
            # Row axis is independent across tiles -> shard across v7x's two
            # TensorCores; no-op on single-TC v5e/v6e.
            dimension_semantics=("parallel",),
            vmem_limit_bytes=48 * 1024 * 1024,
        ),
        cost_estimate=pl.CostEstimate(
            flops=flops, transcendentals=0, bytes_accessed=bytes_accessed),
    )(pooled, cls, w_codex_fused, b_codex_fused.reshape(1, N),
      w_text, b_text.reshape(1, N))

    return codex_out[:B], text_out[:B]


# --------------------------- parameter construction ------------------------


def _xavier_uniform(key, fan_in, fan_out):
    # matches nn.init.xavier_uniform_ (gain=1); stored as (in, out) for x @ W
    bound = (6.0 / (fan_in + fan_out)) ** 0.5
    return jax.random.uniform(
        key, (fan_in, fan_out), dtype=jnp.float32, minval=-bound, maxval=bound
    )


def init_params(key, *, codex_dim=384, text_dim=768, projection_dim=512,
                patch_dim=256, vocab_size=64):
    k = jax.random.split(key, 4)

    # stand-in CodexEncoder patch-embedding
    wp = _xavier_uniform(k[0], patch_dim, codex_dim)
    bp = jnp.zeros((codex_dim,), jnp.float32)
    # codex_projection = nn.Linear(codex_dim, projection_dim), xavier / zero-bias
    w_codex_proj = _xavier_uniform(k[1], codex_dim, projection_dim)
    b_codex_proj = jnp.zeros((projection_dim,), jnp.float32)
    # text_projection = nn.Linear(text_dim, projection_dim), xavier / zero-bias
    w_text_proj = _xavier_uniform(k[2], text_dim, projection_dim)
    b_text_proj = jnp.zeros((projection_dim,), jnp.float32)

    # Constant-fold the (linear) codex chain offline:
    #   pooled @ wp @ wc + (bp @ wc + bc) == (pooled @ wp + bp) @ wc + bc
    w_codex_fused = (wp @ w_codex_proj).astype(jnp.bfloat16)        # (Kp, N)
    b_codex_fused = (bp @ w_codex_proj + b_codex_proj)              # (N,) f32

    params = {
        "w_codex_fused": w_codex_fused,
        "b_codex_fused": b_codex_fused,
        "w_text_proj": w_text_proj.astype(jnp.bfloat16),
        "b_text_proj": b_text_proj,
        # stand-in BERT token embedding table, stored directly in bf16 so the
        # CLS gather reads half the bytes and needs no cast.
        "tok_emb": (0.02 * jax.random.normal(k[3], (vocab_size, text_dim),
                                             jnp.float32)).astype(jnp.bfloat16),
    }
    return params


# -------------------------------- forward ----------------------------------


def codex_clip_cvit_forward(params, data, *, patch=8):
    codex = data["codex"]                       # NCHW [B, C, H, W]
    B, C, H, W = codex.shape
    ph = pw = patch

    # Reduce-before-transpose patch pooling: mean over the patch-grid axes
    # first (shrinks data by P x before any layout shuffle), then flatten in
    # (C, ph, pw) order — identical to unfold -> linear embed -> mean-pool for
    # the linear stand-in encoder.
    pooled = codex.reshape(B, C, H // ph, ph, W // pw, pw).mean(axis=(2, 4))
    pooled = pooled.reshape(B, C * ph * pw).astype(jnp.bfloat16)    # (B, Kp)

    # TODO(synk): full HuggingFace BERT stack not reimplemented; CLS vector =
    # bf16 token-embedding of position 0 (att_mask unused by this stand-in,
    # mirroring last_hidden_state[:, 0, :]).
    text_ids = data["text"]                     # [B, S] int32
    cls = params["tok_emb"][text_ids[:, 0]]     # [B, text_dim] bf16, no cast

    codex_feat, text_feat = pallas_fused_projections(
        pooled, cls,
        params["w_codex_fused"], params["b_codex_fused"],
        params["w_text_proj"], params["b_text_proj"],
    )
    return {"codex": codex_feat, "text": text_feat}


# --------------------------------- main -------------------------------------

if __name__ == "__main__":
    key = jax.random.PRNGKey(0)
    k_param, k_img, k_txt = jax.random.split(key, 3)

    B, C, H, W = 2, 4, 16, 16
    S = 8
    vocab = 64

    params = init_params(k_param, codex_dim=384, text_dim=768,
                         projection_dim=512, patch_dim=C * 8 * 8,
                         vocab_size=vocab)

    data = {
        "codex": jax.random.normal(k_img, (B, C, H, W), jnp.float32),
        "text": jax.random.randint(k_txt, (B, S), 0, vocab, jnp.int32),
        "att_mask": jnp.ones((B, S), jnp.int32),
    }

    out = codex_clip_cvit_forward(params, data)
    jax.block_until_ready(out)

    assert out["codex"].shape == (B, 512)
    assert out["text"].shape == (B, 512)
    assert out["codex"].dtype == jnp.float32
    assert out["text"].dtype == jnp.float32
    print("KERNEL_OK")
</pallas_src>

<mosaic_0001>
module attributes {stable_mosaic.version = 11 : i64} {
  func.func @_fused_clip_kernel(%arg0: i32, %arg1: memref<16x256xbf16, #tpu.memory_space<vmem>>, %arg2: memref<16x768xbf16, #tpu.memory_space<vmem>>, %arg3: memref<256x512xbf16, #tpu.memory_space<vmem>>, %arg4: memref<1x512xf32, #tpu.memory_space<vmem>>, %arg5: memref<768x512xbf16, #tpu.memory_space<vmem>>, %arg6: memref<1x512xf32, #tpu.memory_space<vmem>>, %arg7: memref<16x512xf32, #tpu.memory_space<vmem>>, %arg8: memref<16x512xf32, #tpu.memory_space<vmem>>) attributes {dimension_semantics = [#tpu.dimension_semantics<parallel>], iteration_bounds = array<i64: 1>, scalar_prefetch = 0 : i64, scratch_operands = 0 : i64, tpu.core_type = #tpu.core_type<tc>, window_params = [{transform_indices = @transform_0, window_bounds = array<i64: 16, 256>}, {transform_indices = @transform_1, window_bounds = array<i64: 16, 768>}, {pipeline_mode = #tpu.pipeline_mode<synchronous>, transform_indices = @transform_2, window_bounds = array<i64: 256, 512>}, {pipeline_mode = #tpu.pipeline_mode<synchronous>, transform_indices = @transform_3, window_bounds = array<i64: 1, 512>}, {pipeline_mode = #tpu.pipeline_mode<synchronous>, transform_indices = @transform_4, window_bounds = array<i64: 768, 512>}, {pipeline_mode = #tpu.pipeline_mode<synchronous>, transform_indices = @transform_5, window_bounds = array<i64: 1, 512>}, {transform_indices = @transform_6, window_bounds = array<i64: 16, 512>}, {transform_indices = @transform_7, window_bounds = array<i64: 16, 512>}]} {
    %c0 = arith.constant 0 : index
    %c0_0 = arith.constant 0 : index
    %0 = vector.load %arg1[%c0, %c0_0] : memref<16x256xbf16, #tpu.memory_space<vmem>>, vector<16x256xbf16>
    %c0_1 = arith.constant 0 : index
    %c0_2 = arith.constant 0 : index
    %1 = vector.load %arg3[%c0_1, %c0_2] : memref<256x512xbf16, #tpu.memory_space<vmem>>, vector<256x512xbf16>
    %cst = arith.constant dense<0.000000e+00> : vector<16x512xf32>
    %2 = tpu.matmul %0, %1, %cst {dimension_numbers = #tpu.dot_dimension_numbers<[1], [0], [0], [1], [0, 0, 1, 1], [], []>} : vector<16x256xbf16>, vector<256x512xbf16>, vector<16x512xf32> -> vector<16x512xf32>
    %c0_3 = arith.constant 0 : index
    %c0_4 = arith.constant 0 : index
    %3 = vector.load %arg4[%c0_3, %c0_4] : memref<1x512xf32, #tpu.memory_space<vmem>>, vector<1x512xf32>
    %4 = vector.broadcast %3 : vector<1x512xf32> to vector<16x512xf32>
    %5 = arith.addf %2, %4 : vector<16x512xf32>
    %c0_5 = arith.constant 0 : index
    %c0_6 = arith.constant 0 : index
    %6 = vector.load %arg7[%c0_5, %c0_6] : memref<16x512xf32, #tpu.memory_space<vmem>>, vector<16x512xf32>
    tpu.vector_store %arg7[%c0_5, %c0_6], %5 {strides = array<i32>} : memref<16x512xf32, #tpu.memory_space<vmem>>, vector<16x512xf32>,
    %c0_7 = arith.constant 0 : index
    %c0_8 = arith.constant 0 : index
    %7 = vector.load %arg2[%c0_7, %c0_8] : memref<16x768xbf16, #tpu.memory_space<vmem>>, vector<16x768xbf16>
    %c0_9 = arith.constant 0 : index
    %c0_10 = arith.constant 0 : index
    %8 = vector.load %arg5[%c0_9, %c0_10] : memref<768x512xbf16, #tpu.memory_space<vmem>>, vector<768x512xbf16>
    %cst_11 = arith.constant dense<0.000000e+00> : vector<16x512xf32>
    %9 = tpu.matmul %7, %8, %cst_11 {dimension_numbers = #tpu.dot_dimension_numbers<[1], [0], [0], [1], [0, 0, 1, 1], [], []>} : vector<16x768xbf16>, vector<768x512xbf16>, vector<16x512xf32> -> vector<16x512xf32>
    %c0_12 = arith.constant 0 : index
    %c0_13 = arith.constant 0 : index
    %10 = vector.load %arg6[%c0_12, %c0_13] : memref<1x512xf32, #tpu.memory_space<vmem>>, vector<1x512xf32>
    %11 = vector.broadcast %10 : vector<1x512xf32> to vector<16x512xf32>
    %12 = arith.addf %9, %11 : vector<16x512xf32>
    %c0_14 = arith.constant 0 : index
    %c0_15 = arith.constant 0 : index
    %13 = vector.load %arg8[%c0_14, %c0_15] : memref<16x512xf32, #tpu.memory_space<vmem>>, vector<16x512xf32>
    tpu.vector_store %arg8[%c0_14, %c0_15], %12 {strides = array<i32>} : memref<16x512xf32, #tpu.memory_space<vmem>>, vector<16x512xf32>,
    return
  }
  func.func @transform_0(%arg0: i32) -> (i32, i32) {
    %c0_i32 = arith.constant 0 : i32
    %c0_i32_0 = arith.constant 0 : i32
    return %arg0, %c0_i32 : i32, i32
  }
  func.func @transform_1(%arg0: i32) -> (i32, i32) {
    %c0_i32 = arith.constant 0 : i32
    %c0_i32_0 = arith.constant 0 : i32
    return %arg0, %c0_i32 : i32, i32
  }
  func.func @transform_2(%arg0: i32) -> (i32, i32) {
    %c0_i32 = arith.constant 0 : i32
    %c0_i32_0 = arith.constant 0 : i32
    %c0_i32_1 = arith.constant 0 : i32
    return %c0_i32, %c0_i32_0 : i32, i32
  }
  func.func @transform_3(%arg0: i32) -> (i32, i32) {
    %c0_i32 = arith.constant 0 : i32
    %c0_i32_0 = arith.constant 0 : i32
    %c0_i32_1 = arith.constant 0 : i32
    return %c0_i32, %c0_i32_0 : i32, i32
  }
  func.func @transform_4(%arg0: i32) -> (i32, i32) {
    %c0_i32 = arith.constant 0 : i32
    %c0_i32_0 = arith.constant 0 : i32
    %c0_i32_1 = arith.constant 0 : i32
    return %c0_i32, %c0_i32_0 : i32, i32
  }
  func.func @transform_5(%arg0: i32) -> (i32, i32) {
    %c0_i32 = arith.constant 0 : i32
    %c0_i32_0 = arith.constant 0 : i32
    %c0_i32_1 = arith.constant 0 : i32
    return %c0_i32, %c0_i32_0 : i32, i32
  }
  func.func @transform_6(%arg0: i32) -> (i32, i32) {
    %c0_i32 = arith.constant 0 : i32
    %c0_i32_0 = arith.constant 0 : i32
    return %arg0, %c0_i32 : i32, i32
  }
  func.func @transform_7(%arg0: i32) -> (i32, i32) {
    %c0_i32 = arith.constant 0 : i32
    %c0_i32_0 = arith.constant 0 : i32
    return %arg0, %c0_i32 : i32, i32
  }
}

</mosaic_0001>

<bundles_post_ra>
// kernel: tpu_custom_call.1
= control target key start
LH: loop header
LB: loop body
LE: loop exit
PB: predicated region body
PF: predicated region fallthrough
CT: control target
= control target key end

     0   :  { %13 = vsyncpa [#allocation3], 0  ;;  %s3031_s0 = inlined_call_operand.hbm [shape: bf16[16,256], index: 0, kind: input, shape index: {}]   ;;  %s3032_s1 = inlined_call_operand.hbm [shape: bf16[16,768], index: 1, kind: input, shape index: {}]   ;;  %s3033_s2 = inlined_call_operand.hbm [shape: bf16[256,512], index: 2, kind: input, shape index: {}]   ;;  %s3034_s3 = inlined_call_operand.vmem [shape: f32[1,512], index: 3, kind: input, shape index: {}]   ;;  %s3035_s4 = inlined_call_operand.hbm [shape: bf16[768,512], index: 4, kind: input, shape index: {}]   ;;  %s3036_s5 = inlined_call_operand.vmem [shape: f32[1,512], index: 5, kind: input, shape index: {}]   ;;  %s3037_s6 = inlined_call_operand.hbm [shape: f32[16,512], index: 6, kind: output, shape index: {0}]   ;;  %s3038_s7 = inlined_call_operand.hbm [shape: f32[16,512], index: 7, kind: output, shape index: {1}]  }
   0x1   :  { %14 = vsyncpa [#allocation6], 0 }
   0x2   :  { %15 = vsyncpa [#allocation9], 0 }
   0x3   :  { %16 = vsyncpa [#allocation4], 0 }
   0x4   :  { %17 = vsyncpa [#allocation12], 0  ;;  %s2909_s24 = smov [#allocation5]  }
   0x5   :  { %s35_s25 = sshll.u32 %s2909_s24, 4  ;;  %s36_s25 = int_to_ptr.vmem [resolvable:$true] %s35_s25 }
   0x6   :  { %s2787_s26 = scalar_lea.vmem %s36_s25, 768  ;;  %p2792_p1 = scmp.lt.s32.totalorder %s36_s25, %s36_s25 }
   0x7   :  { %p2788_p0 = scmp.ne.s32.totalorder %s36_s25, %s2787_s26  ;;  %p2793_p2 = scmp.lt.s32.totalorder %s2787_s26, %s2787_s26 }
   0x9   :  { %p2794_p3 = por %p2793_p2, %p2792_p1 }
   0xb   :  { %p2795_p4 = pnand %p2794_p3, %p2788_p0 }
   0xd   :  { %2798 = shalt.err (!%p2795_p4)
}
   0xe   :  { %s2910_s27 = smov 384   ;;  %s2911_s28 = smov 24  }
   0xf   :  { %41 = dma.hbm_to_vmem [thread:$0]  %s3032_s1, 768, %s36_s25, [#allocation6], %s2910_s27, %s2910_s27, %s2911_s28  }
  0x10   :  { %s2912_s8 = smov [#allocation2]  }
  0x11   :  { %s23_s9 = sshll.u32 %s2912_s8, 4  ;;  %s24_s9 = int_to_ptr.vmem [resolvable:$true] %s23_s9 }
  0x12   :  { %s2807_s10 = scalar_lea.vmem %s24_s9, 256  ;;  %p2812_p6 = scmp.lt.s32.totalorder %s24_s9, %s24_s9 }
  0x13   :  { %p2808_p5 = scmp.ne.s32.totalorder %s24_s9, %s2807_s10  ;;  %p2813_p7 = scmp.lt.s32.totalorder %s2807_s10, %s2807_s10 }
  0x15   :  { %p2814_p8 = por %p2813_p7, %p2812_p6 }
  0x17   :  { %p2815_p9 = pnand %p2814_p8, %p2808_p5 }
  0x19   :  { %2818 = shalt.err (!%p2815_p9)
}
  0x1a   :  { %s2913_s11 = smov 128   ;;  %s2914_s12 = smov 8  }
  0x1b   :  { %29 = dma.hbm_to_vmem [thread:$0]  %s3031_s0, 256, %s24_s9, [#allocation3], %s2913_s11, %s2913_s11, %s2914_s12  }
  0x1c   :  { %s2915_s15 = smov [#allocation7]  }
  0x1d   :  { %s47_s16 = sshll.u32 %s2915_s15, 4  ;;  %s48_s16 = int_to_ptr.vmem [resolvable:$true] %s47_s16 }
  0x1e   :  { %s2827_s1 = scalar_lea.vmem %s48_s16, 8192  ;;  %p2832_p11 = scmp.lt.s32.totalorder %s48_s16, %s48_s16 }
  0x1f   :  { %p2828_p10 = scmp.ne.s32.totalorder %s48_s16, %s2827_s1  ;;  %p2833_p12 = scmp.lt.s32.totalorder %s2827_s1, %s2827_s1 }
  0x21   :  { %p2834_p13 = por %p2833_p12, %p2832_p11 }
  0x23   :  { %p2835_p0 = pnand %p2834_p13, %p2828_p10 }
  0x25   :  { %2838 = shalt.err (!%p2835_p0)
}
  0x26   :  { %s2916_s17 = smov 256   ;;  %s2917_s18 = smov 16  }
  0x27   :  { %53 = dma.hbm_to_vmem [thread:$0]  %s3033_s2, 8192, %s48_s16, [#allocation6], %s2916_s17, %s2916_s17, %s2917_s18  }
  0x28   :  { %s2918_s21 = smov [#allocation8]  }
  0x29   :  { %s61_s22 = sshll.u32 %s2918_s21, 4  ;;  %s62_s22 = int_to_ptr.vmem [resolvable:$true] %s61_s22 }
  0x2a   :  { %s2847_s0 = scalar_lea.vmem %s62_s22, 24576  ;;  %p2852_p2 = scmp.lt.s32.totalorder %s62_s22, %s62_s22 }
  0x2b   :  { %p2848_p1 = scmp.ne.s32.totalorder %s62_s22, %s2847_s0  ;;  %p2853_p3 = scmp.lt.s32.totalorder %s2847_s0, %s2847_s0 }
  0x2d   :  { %p2854_p4 = por %p2853_p3, %p2852_p2 }
  0x2f   :  { %p2855_p5 = pnand %p2854_p4, %p2848_p1 }
  0x31   :  { %2858 = shalt.err (!%p2855_p5)
}
  0x32   :  { %67 = dma.hbm_to_vmem [thread:$0]  %s3035_s4, 24576, %s62_s22, [#allocation9], %s2916_s17, %s2916_s17, %s2917_s18  }
  0x33   :  { %2899 = dma.done.wait [#allocation3], 256  }
  0x34   :  { %2900 = vsyncadd [#allocation3], 4294967040 }
  0x35   :  { %2901 = dma.done.wait [#allocation6], 8960  }
  0x36   :  { %2902 = vsyncadd [#allocation6], 4294958336 }
  0x37   :  { %2903 = dma.done.wait [#allocation9], 24576  }
  0x38   :  { %2904 = vsyncadd [#allocation9], 4294942720  ;;  %v2383_v0 = vld [vmem:[#allocation7 + $0xe4] ss:$16 sps:$4 sm:$0xff]   ;;  %v2385_v1 = vld [vmem:[#allocation7 + $0xec] ss:$16 sps:$4 sm:$0xff]  }
  0x39   :  { %500 = vmatprep.subr.bf16.mxu0 %v2383_v0  ;;  %v2387_v2 = vld [vmem:[#allocation7 + $0xe0] ss:$16 sps:$4 sm:$0xff]   ;;  %v2388_v3 = vld [vmem:[#allocation7 + $0xe8] ss:$16 sps:$4 sm:$0xff]   ;;  %543 = vmatprep.subr.bf16.mxu1 %v2385_v1  ;;  %v2389_v4 = vld [vmem:[#allocation7 + $0xc4] ss:$16 sps:$4 sm:$0xff]  }
  0x3a   :  { %501 = vmatpush1.bf16.msra.mxu0 %v2387_v2  ;;  %544 = vmatpush1.bf16.msra.mxu1 %v2388_v3  ;;  %v2391_v5 = vld [vmem:[#allocation7 + $0xcc] ss:$16 sps:$4 sm:$0xff]   ;;  %v2393_v6 = vld [vmem:[#allocation7 + $0xc0] ss:$16 sps:$4 sm:$0xff]   ;;  %v2394_v7 = vld [vmem:[#allocation7 + $0xc8] ss:$16 sps:$4 sm:$0xff]  }
  0x3b   :  { %502 = vmatprep.subr.bf16.mxu0 %v2389_v4  ;;  %545 = vmatprep.subr.bf16.mxu1 %v2391_v5  ;;  %v2395_v8 = vld [vmem:[#allocation7 + $0xa4] ss:$16 sps:$4 sm:$0xff]   ;;  %v2397_v9 = vld [vmem:[#allocation7 + $0xac] ss:$16 sps:$4 sm:$0xff]   ;;  %v2399_v10 = vld [vmem:[#allocation7 + $0xa0] ss:$16 sps:$4 sm:$0xff]  }
  0x3c   :  { %v2400_v11 = vld [vmem:[#allocation7 + $0xa8] ss:$16 sps:$4 sm:$0xff]   ;;  %v2401_v12 = vld [vmem:[#allocation7 + $0x84] ss:$16 sps:$4 sm:$0xff]   ;;  %v2403_v13 = vld [vmem:[#allocation7 + $0x8c] ss:$16 sps:$4 sm:$0xff]  }
  0x3d   :  { %v2405_v14 = vld [vmem:[#allocation7 + $0x80] ss:$16 sps:$4 sm:$0xff]   ;;  %v2406_v15 = vld [vmem:[#allocation7 + $0x88] ss:$16 sps:$4 sm:$0xff]   ;;  %v2407_v16 = vld [vmem:[#allocation7 + $0x64] ss:$16 sps:$4 sm:$0xff]  }
  0x3e   :  { %503 = vmatpush1.bf16.msra.mxu0 %v2393_v6  ;;  %546 = vmatpush1.bf16.msra.mxu1 %v2394_v7  ;;  %v2409_v17 = vld [vmem:[#allocation7 + $0x6c] ss:$16 sps:$4 sm:$0xff]   ;;  %v2411_v18 = vld [vmem:[#allocation7 + $0x60] ss:$16 sps:$4 sm:$0xff]   ;;  %v2412_v19 = vld [vmem:[#allocation7 + $0x68] ss:$16 sps:$4 sm:$0xff]  }
  0x3f   :  { %504 = vmatprep.subr.bf16.mxu0 %v2395_v8  ;;  %547 = vmatprep.subr.bf16.mxu1 %v2397_v9  ;;  %v2413_v20 = vld [vmem:[#allocation7 + $0x44] ss:$16 sps:$4 sm:$0xff]   ;;  %v2415_v21 = vld [vmem:[#allocation7 + $0x4c] ss:$16 sps:$4 sm:$0xff]   ;;  %v2417_v22 = vld [vmem:[#allocation7 + $0x40] ss:$16 sps:$4 sm:$0xff]  }
  0x40   :  { %v2418_v23 = vld [vmem:[#allocation7 + $0x48] ss:$16 sps:$4 sm:$0xff]   ;;  %v2419_v24 = vld [vmem:[#allocation7 + $0x24] ss:$16 sps:$4 sm:$0xff]   ;;  %v2421_v25 = vld [vmem:[#allocation7 + $0x2c] ss:$16 sps:$4 sm:$0xff]  }
  0x41   :  { %v2423_v26 = vld [vmem:[#allocation7 + $0x20] ss:$16 sps:$4 sm:$0xff]   ;;  %v2424_v27 = vld [vmem:[#allocation7 + $0x28] ss:$16 sps:$4 sm:$0xff]   ;;  %v2425_v28 = vld [vmem:[#allocation7 + $0x4] ss:$16 sps:$4 sm:$0xff]  }
  0x42   :  { %505 = vmatpush1.bf16.msra.mxu0 %v2399_v10  ;;  %548 = vmatpush1.bf16.msra.mxu1 %v2400_v11  ;;  %v2427_v29 = vld [vmem:[#allocation7 + $0xc] ss:$16 sps:$4 sm:$0xff]   ;;  %v2429_v30 = vld [vmem:[#allocation7] ss:$16 sps:$4 sm:$0xff]   ;;  %v2430_v31 = vld [vmem:[#allocation7 + $0x8] ss:$16 sps:$4 sm:$0xff]  }
  0x43   :  { %506 = vmatprep.subr.bf16.mxu0 %v2401_v12  ;;  %549 = vmatprep.subr.bf16.mxu1 %v2403_v13  ;;  %v2431_v32 = vld [vmem:[#allocation7 + $0x1e4] ss:$16 sps:$4 sm:$0xff]   ;;  %v2433_v33 = vld [vmem:[#allocation7 + $0x1ec] ss:$16 sps:$4 sm:$0xff]   ;;  %v2435_v34 = vld [vmem:[#allocation7 + $0x1e0] ss:$16 sps:$4 sm:$0xff]  }
  0x44   :  { %v2436_v35 = vld [vmem:[#allocation7 + $0x1e8] ss:$16 sps:$4 sm:$0xff]   ;;  %v2437_v36 = vld [vmem:[#allocation7 + $0x1c4] ss:$16 sps:$4 sm:$0xff]   ;;  %v2439_v37 = vld [vmem:[#allocation7 + $0x1cc] ss:$16 sps:$4 sm:$0xff]  }
  0x45   :  { %v2441_v38 = vld [vmem:[#allocation7 + $0x1c0] ss:$16 sps:$4 sm:$0xff]   ;;  %v2442_v39 = vld [vmem:[#allocation7 + $0x1c8] ss:$16 sps:$4 sm:$0xff]   ;;  %v2443_v40 = vld [vmem:[#allocation7 + $0x1a4] ss:$16 sps:$4 sm:$0xff]  }
  0x46   :  { %507 = vmatpush1.bf16.msra.mxu0 %v2405_v14  ;;  %550 = vmatpush1.bf16.msra.mxu1 %v2406_v15  ;;  %v2445_v41 = vld [vmem:[#allocation7 + $0x1ac] ss:$16 sps:$4 sm:$0xff]   ;;  %v2447_v42 = vld [vmem:[#allocation7 + $0x1a0] ss:$16 sps:$4 sm:$0xff]   ;;  %v2448_v43 = vld [vmem:[#allocation7 + $0x1a8] ss:$16 sps:$4 sm:$0xff]  }
  0x47   :  { %508 = vmatprep.subr.bf16.mxu0 %v2407_v16  ;;  %551 = vmatprep.subr.bf16.mxu1 %v2409_v17  ;;  %v2449_v44 = vld [vmem:[#allocation7 + $0x184] ss:$16 sps:$4 sm:$0xff]   ;;  %v2451_v45 = vld [vmem:[#allocation7 + $0x18c] ss:$16 sps:$4 sm:$0xff]   ;;  %v2453_v46 = vld [vmem:[#allocation7 + $0x180] ss:$16 sps:$4 sm:$0xff]  }
  0x48   :  { %v2454_v47 = vld [vmem:[#allocation7 + $0x188] ss:$16 sps:$4 sm:$0xff]   ;;  %v2481_v48 = vld [vmem:[#allocation2 + $0x4] ss:$8 sps:$4 sm:$0xff]   ;;  %v2459_v51 = vld [vmem:[#allocation7 + $0x160] ss:$16 sps:$4 sm:$0xff]  }
  0x49   :  { %v2455_v49 = vld [vmem:[#allocation7 + $0x164] ss:$16 sps:$4 sm:$0xff]   ;;  %v2457_v50 = vld [vmem:[#allocation7 + $0x16c] ss:$16 sps:$4 sm:$0xff]   ;;  %532 = vmatprep.mubr.bf16.mxu0 %v2481_v48  ;;  %575 = vmatprep.mubr.bf16.mxu1 %v2481_v48  ;;  %v2460_v52 = vld [vmem:[#allocation7 + $0x168] ss:$16 sps:$4 sm:$0xff]  }
  0x4a   :  { %509 = vmatpush1.bf16.msra.mxu0 %v2411_v18  ;;  %552 = vmatpush1.bf16.msra.mxu1 %v2412_v19  ;;  %v2461_v53 = vld [vmem:[#allocation7 + $0x144] ss:$16 sps:$4 sm:$0xff]   ;;  %v2463_v54 = vld [vmem:[#allocation7 + $0x14c] ss:$16 sps:$4 sm:$0xff]   ;;  %v2465_v55 = vld [vmem:[#allocation7 + $0x140] ss:$16 sps:$4 sm:$0xff]  }
  0x4b   :  { %510 = vmatprep.subr.bf16.mxu0 %v2413_v20  ;;  %553 = vmatprep.subr.bf16.mxu1 %v2415_v21  ;;  %v2466_v56 = vld [vmem:[#allocation7 + $0x148] ss:$16 sps:$4 sm:$0xff]   ;;  %v2467_v57 = vld [vmem:[#allocation7 + $0x124] ss:$16 sps:$4 sm:$0xff]   ;;  %v2469_v58 = vld [vmem:[#allocation7 + $0x12c] ss:$16 sps:$4 sm:$0xff]  }
  0x4c   :  { %v2471_v59 = vld [vmem:[#allocation7 + $0x120] ss:$16 sps:$4 sm:$0xff]   ;;  %v2472_v60 = vld [vmem:[#allocation7 + $0x128] ss:$16 sps:$4 sm:$0xff]   ;;  %v2473_v61 = vld [vmem:[#allocation7 + $0x104] ss:$16 sps:$4 sm:$0xff]  }
  0x4d   :  { %v2475_v62 = vld [vmem:[#allocation7 + $0x10c] ss:$16 sps:$4 sm:$0xff]   ;;  %v2477_v63 = vld [vmem:[#allocation7 + $0x100] ss:$16 sps:$4 sm:$0xff]   ;;  %v2478_v0 = vld [vmem:[#allocation7 + $0x108] ss:$16 sps:$4 sm:$0xff]  }
  0x4e   :  { %511 = vmatpush1.bf16.msra.mxu0 %v2417_v22  ;;  %554 = vmatpush1.bf16.msra.mxu1 %v2418_v23  ;;  %v2484_v1 = vld [vmem:[#allocation8 + $0xe4] ss:$16 sps:$4 sm:$0xff]   ;;  %v2479_v3 = vld [vmem:[#allocation2] ss:$8 sps:$4 sm:$0xff]  }
  0x4f   :  { %512 = vmatprep.subr.bf16.mxu0 %v2419_v24  ;;  %555 = vmatprep.subr.bf16.mxu1 %v2421_v25  ;;  %v2487_v2 = vld [vmem:[#allocation8 + $0x2e4] ss:$16 sps:$4 sm:$0xff]   ;;  %v2482_v4 = vld [vmem:[#allocation8 + $0xe0] ss:$16 sps:$4 sm:$0xff]  }
  0x50   :  { %v2485_v5 = vld [vmem:[#allocation8 + $0x2e0] ss:$16 sps:$4 sm:$0xff]   ;;  %v2490_v6 = vld [vmem:[#allocation8 + $0xc4] ss:$16 sps:$4 sm:$0xff]  }
  0x51   :  { %v2493_v7 = vld [vmem:[#allocation8 + $0x2c4] ss:$16 sps:$4 sm:$0xff]   ;;  %v2488_v8 = vld [vmem:[#allocation8 + $0xc0] ss:$16 sps:$4 sm:$0xff]  }
  0x52   :  { %513 = vmatpush1.bf16.msra.mxu0 %v2423_v26  ;;  %556 = vmatpush1.bf16.msra.mxu1 %v2424_v27  ;;  %v2491_v9 = vld [vmem:[#allocation8 + $0x2c0] ss:$16 sps:$4 sm:$0xff]   ;;  %v2496_v10 = vld [vmem:[#allocation8 + $0xa4] ss:$16 sps:$4 sm:$0xff]  }
  0x53   :  { %514 = vmatprep.subr.bf16.mxu0 %v2425_v28  ;;  %557 = vmatprep.subr.bf16.mxu1 %v2427_v29  ;;  %v2499_v11 = vld [vmem:[#allocation8 + $0x2a4] ss:$16 sps:$4 sm:$0xff]   ;;  %v2494_v12 = vld [vmem:[#allocation8 + $0xa0] ss:$16 sps:$4 sm:$0xff]  }
  0x54   :  { %v2497_v13 = vld [vmem:[#allocation8 + $0x2a0] ss:$16 sps:$4 sm:$0xff]   ;;  %v2502_v14 = vld [vmem:[#allocation8 + $0x84] ss:$16 sps:$4 sm:$0xff]  }
  0x55   :  { %v2505_v15 = vld [vmem:[#allocation8 + $0x284] ss:$16 sps:$4 sm:$0xff]   ;;  %v2500_v16 = vld [vmem:[#allocation8 + $0x80] ss:$16 sps:$4 sm:$0xff]  }
  0x56   :  { %515 = vmatpush1.bf16.msra.mxu0 %v2429_v30  ;;  %558 = vmatpush1.bf16.msra.mxu1 %v2430_v31  ;;  %v2503_v17 = vld [vmem:[#allocation8 + $0x280] ss:$16 sps:$4 sm:$0xff]   ;;  %v2508_v18 = vld [vmem:[#allocation8 + $0x64] ss:$16 sps:$4 sm:$0xff]  }
  0x57   :  { %516 = vmatprep.subr.bf16.mxu0 %v2431_v32  ;;  %559 = vmatprep.subr.bf16.mxu1 %v2433_v33  ;;  %v2511_v19 = vld [vmem:[#allocation8 + $0x264] ss:$16 sps:$4 sm:$0xff]   ;;  %v2506_v20 = vld [vmem:[#allocation8 + $0x60] ss:$16 sps:$4 sm:$0xff]  }
  0x58   :  { %v2509_v21 = vld [vmem:[#allocation8 + $0x260] ss:$16 sps:$4 sm:$0xff]   ;;  %v2514_v22 = vld [vmem:[#allocation8 + $0x44] ss:$16 sps:$4 sm:$0xff]  }
  0x59   :  { %v2517_v23 = vld [vmem:[#allocation8 + $0x244] ss:$16 sps:$4 sm:$0xff]   ;;  %v2512_v24 = vld [vmem:[#allocation8 + $0x40] ss:$16 sps:$4 sm:$0xff]  }
  0x5a   :  { %517 = vmatpush2.bf16.msra.mxu0 %v2435_v34  ;;  %560 = vmatpush2.bf16.msra.mxu1 %v2436_v35  ;;  %v2515_v25 = vld [vmem:[#allocation8 + $0x240] ss:$16 sps:$4 sm:$0xff]   ;;  %v2520_v26 = vld [vmem:[#allocation8 + $0x24] ss:$16 sps:$4 sm:$0xff]  }
  0x5b   :  { %518 = vmatprep.subr.bf16.mxu0 %v2437_v36  ;;  %561 = vmatprep.subr.bf16.mxu1 %v2439_v37  ;;  %v2523_v27 = vld [vmem:[#allocation8 + $0x224] ss:$16 sps:$4 sm:$0xff]   ;;  %v2518_v28 = vld [vmem:[#allocation8 + $0x20] ss:$16 sps:$4 sm:$0xff]  }
  0x5c   :  { %v2521_v29 = vld [vmem:[#allocation8 + $0x220] ss:$16 sps:$4 sm:$0xff]   ;;  %v2526_v30 = vld [vmem:[#allocation8 + $0x4] ss:$16 sps:$4 sm:$0xff]  }
  0x5d   :  { %v2975_v31 = vld [vmem:[#allocation5 + $0x4] ss:$24 sps:$4 sm:$0xff]   ;;  %v2524_v34 = vld [vmem:[#allocation8] ss:$16 sps:$4 sm:$0xff]  }
  0x5e   :  { %519 = vmatpush2.bf16.msra.mxu0 %v2441_v38  ;;  %562 = vmatpush2.bf16.msra.mxu1 %v2442_v39  ;;  %v2529_v32 = vld [vmem:[#allocation8 + $0x204] ss:$16 sps:$4 sm:$0xff]   ;;  %v2527_v35 = vld [vmem:[#allocation8 + $0x200] ss:$16 sps:$4 sm:$0xff]  }
  0x5f   :  { %520 = vmatprep.subr.bf16.mxu0 %v2443_v40  ;;  %563 = vmatprep.subr.bf16.mxu1 %v2445_v41  ;;  %v2977_v33 = vld [vmem:[#allocation5 + $0xc] ss:$24 sps:$4 sm:$0xff]   ;;  %v2530_v38 = vld [vmem:[#allocation8 + $0x1e0] ss:$16 sps:$4 sm:$0xff]  }
  0x60   :  { %v2532_v36 = vld [vmem:[#allocation8 + $0x1e4] ss:$16 sps:$4 sm:$0xff]   ;;  %v2533_v39 = vld [vmem:[#allocation8 + $0x3e0] ss:$16 sps:$4 sm:$0xff]  }
  0x61   :  { %v2535_v37 = vld [vmem:[#allocation8 + $0x3e4] ss:$16 sps:$4 sm:$0xff]  }
  0x62   :  { %521 = vmatpush2.bf16.msra.mxu0 %v2447_v42  ;;  %564 = vmatpush2.bf16.msra.mxu1 %v2448_v43  ;;  %v2538_v40 = vld [vmem:[#allocation8 + $0x1c4] ss:$16 sps:$4 sm:$0xff]   ;;  %v2536_v42 = vld [vmem:[#allocation8 + $0x1c0] ss:$16 sps:$4 sm:$0xff]  }
  0x63   :  { %522 = vmatprep.subr.bf16.mxu0 %v2449_v44  ;;  %565 = vmatprep.subr.bf16.mxu1 %v2451_v45  ;;  %v2541_v41 = vld [vmem:[#allocation8 + $0x3c4] ss:$16 sps:$4 sm:$0xff]   ;;  %v2539_v43 = vld [vmem:[#allocation8 + $0x3c0] ss:$16 sps:$4 sm:$0xff]  }
  0x64   :  { %v2544_v44 = vld [vmem:[#allocation8 + $0x1a4] ss:$16 sps:$4 sm:$0xff]  }
  0x65   :  { %v2547_v45 = vld [vmem:[#allocation8 + $0x3a4] ss:$16 sps:$4 sm:$0xff]  }
  0x66   :  { %523 = vmatpush2.bf16.msra.mxu0 %v2453_v46  ;;  %566 = vmatpush2.bf16.msra.mxu1 %v2454_v47  ;;  %v2542_v46 = vld [vmem:[#allocation8 + $0x1a0] ss:$16 sps:$4 sm:$0xff]   ;;  %v2550_v48 = vld [vmem:[#allocation8 + $0x184] ss:$16 sps:$4 sm:$0xff]  }
  0x67   :  { %524 = vmatprep.subr.bf16.mxu0 %v2455_v49  ;;  %567 = vmatprep.subr.bf16.mxu1 %v2457_v50  ;;  %v2545_v47 = vld [vmem:[#allocation8 + $0x3a0] ss:$16 sps:$4 sm:$0xff]   ;;  %v2553_v49 = vld [vmem:[#allocation8 + $0x384] ss:$16 sps:$4 sm:$0xff]  }
  0x68   :  { %v2548_v50 = vld [vmem:[#allocation8 + $0x180] ss:$16 sps:$4 sm:$0xff]  }
  0x6a   :  { %525 = vmatpush2.bf16.msra.mxu0 %v2459_v51  ;;  %568 = vmatpush2.bf16.msra.mxu1 %v2460_v52  ;;  %v2551_v51 = vld [vmem:[#allocation8 + $0x380] ss:$16 sps:$4 sm:$0xff]   ;;  %v2556_v52 = vld [vmem:[#allocation8 + $0x164] ss:$16 sps:$4 sm:$0xff]  }
  0x6b   :  { %526 = vmatprep.subr.bf16.mxu0 %v2461_v53  ;;  %569 = vmatprep.subr.bf16.mxu1 %v2463_v54  ;;  %v2559_v53 = vld [vmem:[#allocation8 + $0x364] ss:$16 sps:$4 sm:$0xff]   ;;  %v2554_v54 = vld [vmem:[#allocation8 + $0x160] ss:$16 sps:$4 sm:$0xff]  }
  0x6e   :  { %527 = vmatpush2.bf16.msra.mxu0 %v2465_v55  ;;  %570 = vmatpush2.bf16.msra.mxu1 %v2466_v56  ;;  %v2557_v55 = vld [vmem:[#allocation8 + $0x360] ss:$16 sps:$4 sm:$0xff]   ;;  %v2562_v56 = vld [vmem:[#allocation8 + $0x144] ss:$16 sps:$4 sm:$0xff]  }
  0x6f   :  { %528 = vmatprep.subr.bf16.mxu0 %v2467_v57  ;;  %571 = vmatprep.subr.bf16.mxu1 %v2469_v58  ;;  %v2565_v57 = vld [vmem:[#allocation8 + $0x344] ss:$16 sps:$4 sm:$0xff]   ;;  %v2560_v58 = vld [vmem:[#allocation8 + $0x140] ss:$16 sps:$4 sm:$0xff]  }
  0x72   :  { %529 = vmatpush2.bf16.msra.mxu0 %v2471_v59  ;;  %572 = vmatpush2.bf16.msra.mxu1 %v2472_v60  ;;  %v2563_v59 = vld [vmem:[#allocation8 + $0x340] ss:$16 sps:$4 sm:$0xff]   ;;  %v2568_v60 = vld [vmem:[#allocation8 + $0x124] ss:$16 sps:$4 sm:$0xff]  }
  0x73   :  { %530 = vmatprep.subr.bf16.mxu0 %v2473_v61  ;;  %573 = vmatprep.subr.bf16.mxu1 %v2475_v62  ;;  %v2571_v61 = vld [vmem:[#allocation8 + $0x324] ss:$16 sps:$4 sm:$0xff]   ;;  %v2566_v62 = vld [vmem:[#allocation8 + $0x120] ss:$16 sps:$4 sm:$0xff]  }
  0x76   :  { %531 = vmatpush2.bf16.msra.mxu0 %v2477_v63  ;;  %574 = vmatpush2.bf16.msra.mxu1 %v2478_v0  ;;  %v2569_v63 = vld [vmem:[#allocation8 + $0x320] ss:$16 sps:$4 sm:$0xff]   ;;  %v2574_v0 = vld [vmem:[#allocation8 + $0x104] ss:$16 sps:$4 sm:$0xff]  }
  0x77   :  { %1804 = vmatprep.subr.bf16.mxu0 %v2484_v1  ;;  %1847 = vmatprep.subr.bf16.mxu1 %v2487_v2  ;;  %v2577_v1 = vld [vmem:[#allocation8 + $0x304] ss:$16 sps:$4 sm:$0xff]   ;;  %v2572_v2 = vld [vmem:[#allocation8 + $0x100] ss:$16 sps:$4 sm:$0xff]  }
  0x79   :  { %533 = vmatmul.mubr.bf16.vlgmr.msra.gmra.mxu0 %v2479_v3  ;;  %576 = vmatmul.mubr.bf16.vlgmr.msra.gmra.mxu1 %v2479_v3  ;;  %v2575_v3 = vld [vmem:[#allocation8 + $0x300] ss:$16 sps:$4 sm:$0xff]  }
  0x7a   :  { %1805 = vmatpush1.bf16.msra.mxu0 %v2482_v4  ;;  %1848 = vmatpush1.bf16.msra.mxu1 %v2485_v5  ;;  %v2586_v4 = vld [vmem:[#allocation8 + $0x4e4] ss:$16 sps:$4 sm:$0xff]   ;;  %v2589_v5 = vld [vmem:[#allocation8 + $0xec] ss:$16 sps:$4 sm:$0xff]  }
  0x7b   :  { %1806 = vmatprep.subr.bf16.mxu0 %v2490_v6  ;;  %1849 = vmatprep.subr.bf16.mxu1 %v2493_v7  ;;  %v2981_v6 = vld [vmem:[#allocation5] ss:$24 sps:$4 sm:$0xff]  }
  0x7c   :  { %1836 = vmatprep.mubr.bf16.mxu0 %v2975_v31  ;;  %1879 = vmatprep.mubr.bf16.mxu1 %v2977_v33  ;;  %v2983_v7 = vld [vmem:[#allocation5 + $0x8] ss:$24 sps:$4 sm:$0xff]  }
  0x7e   :  { %1807 = vmatpush1.bf16.msra.mxu0 %v2488_v8  ;;  %1850 = vmatpush1.bf16.msra.mxu1 %v2491_v9  ;;  %v2584_v8 = vld [vmem:[#allocation8 + $0x4e0] ss:$16 sps:$4 sm:$0xff]   ;;  %v2587_v9 = vld [vmem:[#allocation8 + $0xe8] ss:$16 sps:$4 sm:$0xff]  }
  0x7f   :  { %1808 = vmatprep.subr.bf16.mxu0 %v2496_v10  ;;  %1851 = vmatprep.subr.bf16.mxu1 %v2499_v11  ;;  %v2592_v10 = vld [vmem:[#allocation8 + $0x4c4] ss:$16 sps:$4 sm:$0xff]   ;;  %v2595_v11 = vld [vmem:[#allocation8 + $0xcc] ss:$16 sps:$4 sm:$0xff]  }
  0x82   :  { %1809 = vmatpush1.bf16.msra.mxu0 %v2494_v12  ;;  %1852 = vmatpush1.bf16.msra.mxu1 %v2497_v13  ;;  %v2590_v12 = vld [vmem:[#allocation8 + $0x4c0] ss:$16 sps:$4 sm:$0xff]   ;;  %v2593_v13 = vld [vmem:[#allocation8 + $0xc8] ss:$16 sps:$4 sm:$0xff]  }
  0x83   :  { %1810 = vmatprep.subr.bf16.mxu0 %v2502_v14  ;;  %1853 = vmatprep.subr.bf16.mxu1 %v2505_v15  ;;  %v2598_v14 = vld [vmem:[#allocation8 + $0x4a4] ss:$16 sps:$4 sm:$0xff]   ;;  %v2601_v15 = vld [vmem:[#allocation8 + $0xac] ss:$16 sps:$4 sm:$0xff]  }
  0x86   :  { %1811 = vmatpush1.bf16.msra.mxu0 %v2500_v16  ;;  %1854 = vmatpush1.bf16.msra.mxu1 %v2503_v17  ;;  %v2987_v16 = vld [vmem:[#allocation5 + $0x14] ss:$24 sps:$4 sm:$0xff]   ;;  %v2596_v17 = vld [vmem:[#allocation8 + $0x4a0] ss:$16 sps:$4 sm:$0xff]  }
  0x87   :  { %1812 = vmatprep.subr.bf16.mxu0 %v2508_v18  ;;  %1855 = vmatprep.subr.bf16.mxu1 %v2511_v19  ;;  %v2599_v18 = vld [vmem:[#allocation8 + $0xa8] ss:$16 sps:$4 sm:$0xff]   ;;  %v2604_v19 = vld [vmem:[#allocation8 + $0x484] ss:$16 sps:$4 sm:$0xff]  }
  0x8a   :  { %1813 = vmatpush1.bf16.msra.mxu0 %v2506_v20  ;;  %1856 = vmatpush1.bf16.msra.mxu1 %v2509_v21  ;;  %v2607_v20 = vld [vmem:[#allocation8 + $0x8c] ss:$16 sps:$4 sm:$0xff]   ;;  %v2602_v21 = vld [vmem:[#allocation8 + $0x480] ss:$16 sps:$4 sm:$0xff]  }
  0x8b   :  { %1814 = vmatprep.subr.bf16.mxu0 %v2514_v22  ;;  %1857 = vmatprep.subr.bf16.mxu1 %v2517_v23  ;;  %v2605_v22 = vld [vmem:[#allocation8 + $0x88] ss:$16 sps:$4 sm:$0xff]   ;;  %v2610_v23 = vld [vmem:[#allocation8 + $0x464] ss:$16 sps:$4 sm:$0xff]  }
  0x8e   :  { %1815 = vmatpush1.bf16.msra.mxu0 %v2512_v24  ;;  %1858 = vmatpush1.bf16.msra.mxu1 %v2515_v25  ;;  %v2613_v24 = vld [vmem:[#allocation8 + $0x6c] ss:$16 sps:$4 sm:$0xff]   ;;  %v2608_v25 = vld [vmem:[#allocation8 + $0x460] ss:$16 sps:$4 sm:$0xff]  }
  0x8f   :  { %1816 = vmatprep.subr.bf16.mxu0 %v2520_v26  ;;  %1859 = vmatprep.subr.bf16.mxu1 %v2523_v27  ;;  %v2611_v26 = vld [vmem:[#allocation8 + $0x68] ss:$16 sps:$4 sm:$0xff]   ;;  %v2616_v27 = vld [vmem:[#allocation8 + $0x444] ss:$16 sps:$4 sm:$0xff]  }
  0x92   :  { %1817 = vmatpush1.bf16.msra.mxu0 %v2518_v28  ;;  %1860 = vmatpush1.bf16.msra.mxu1 %v2521_v29  ;;  %v2619_v28 = vld [vmem:[#allocation8 + $0x4c] ss:$16 sps:$4 sm:$0xff]   ;;  %v2614_v29 = vld [vmem:[#allocation8 + $0x440] ss:$16 sps:$4 sm:$0xff]  }
  0x93   :  { %1818 = vmatprep.subr.bf16.mxu0 %v2526_v30  ;;  %1861 = vmatprep.subr.bf16.mxu1 %v2529_v32  ;;  %v2617_v30 = vld [vmem:[#allocation8 + $0x48] ss:$16 sps:$4 sm:$0xff]   ;;  %v2625_v32 = vld [vmem:[#allocation8 + $0x2c] ss:$16 sps:$4 sm:$0xff]  }
  0x96   :  { %1819 = vmatpush1.bf16.msra.mxu0 %v2524_v34  ;;  %1862 = vmatpush1.bf16.msra.mxu1 %v2527_v35  ;;  %v2620_v34 = vld [vmem:[#allocation8 + $0x420] ss:$16 sps:$4 sm:$0xff]   ;;  %v2623_v35 = vld [vmem:[#allocation8 + $0x28] ss:$16 sps:$4 sm:$0xff]  }
  0x97   :  { %1820 = vmatprep.subr.bf16.mxu0 %v2532_v36  ;;  %1863 = vmatprep.subr.bf16.mxu1 %v2535_v37  ;;  %v2628_v36 = vld [vmem:[#allocation8 + $0x404] ss:$16 sps:$4 sm:$0xff]   ;;  %v2631_v37 = vld [vmem:[#allocation8 + $0xc] ss:$16 sps:$4 sm:$0xff]  }
  0x9a   :  { %1821 = vmatpush2.bf16.msra.mxu0 %v2530_v38  ;;  %1864 = vmatpush2.bf16.msra.mxu1 %v2533_v39  ;;  %v2626_v38 = vld [vmem:[#allocation8 + $0x400] ss:$16 sps:$4 sm:$0xff]   ;;  %v2629_v39 = vld [vmem:[#allocation8 + $0x8] ss:$16 sps:$4 sm:$0xff]  }
  0x9b   :  { %1822 = vmatprep.subr.bf16.mxu0 %v2538_v40  ;;  %1865 = vmatprep.subr.bf16.mxu1 %v2541_v41  ;;  %v2634_v40 = vld [vmem:[#allocation8 + $0x5e4] ss:$16 sps:$4 sm:$0xff]   ;;  %v2637_v41 = vld [vmem:[#allocation8 + $0x1ec] ss:$16 sps:$4 sm:$0xff]  }
  0x9e   :  { %1823 = vmatpush2.bf16.msra.mxu0 %v2536_v42  ;;  %1866 = vmatpush2.bf16.msra.mxu1 %v2539_v43  ;;  %v2632_v42 = vld [vmem:[#allocation8 + $0x5e0] ss:$16 sps:$4 sm:$0xff]   ;;  %v2635_v43 = vld [vmem:[#allocation8 + $0x1e8] ss:$16 sps:$4 sm:$0xff]  }
  0x9f   :  { %1824 = vmatprep.subr.bf16.mxu0 %v2544_v44  ;;  %1867 = vmatprep.subr.bf16.mxu1 %v2547_v45  ;;  %v2640_v44 = vld [vmem:[#allocation8 + $0x5c4] ss:$16 sps:$4 sm:$0xff]   ;;  %v2643_v45 = vld [vmem:[#allocation8 + $0x1cc] ss:$16 sps:$4 sm:$0xff]  }
  0xa2   :  { %1825 = vmatpush2.bf16.msra.mxu0 %v2542_v46  ;;  %1868 = vmatpush2.bf16.msra.mxu1 %v2545_v47  ;;  %v2638_v46 = vld [vmem:[#allocation8 + $0x5c0] ss:$16 sps:$4 sm:$0xff]   ;;  %v2641_v47 = vld [vmem:[#allocation8 + $0x1c8] ss:$16 sps:$4 sm:$0xff]  }
  0xa3   :  { %1826 = vmatprep.subr.bf16.mxu0 %v2550_v48  ;;  %1869 = vmatprep.subr.bf16.mxu1 %v2553_v49  ;;  %v2646_v48 = vld [vmem:[#allocation8 + $0x5a4] ss:$16 sps:$4 sm:$0xff]   ;;  %v2649_v49 = vld [vmem:[#allocation8 + $0x1ac] ss:$16 sps:$4 sm:$0xff]  }
  0xa6   :  { %1827 = vmatpush2.bf16.msra.mxu0 %v2548_v50  ;;  %1870 = vmatpush2.bf16.msra.mxu1 %v2551_v51  ;;  %v2644_v50 = vld [vmem:[#allocation8 + $0x5a0] ss:$16 sps:$4 sm:$0xff]   ;;  %v2647_v51 = vld [vmem:[#allocation8 + $0x1a8] ss:$16 sps:$4 sm:$0xff]  }
  0xa7   :  { %1828 = vmatprep.subr.bf16.mxu0 %v2556_v52  ;;  %1871 = vmatprep.subr.bf16.mxu1 %v2559_v53  ;;  %v2652_v52 = vld [vmem:[#allocation8 + $0x584] ss:$16 sps:$4 sm:$0xff]   ;;  %v2655_v53 = vld [vmem:[#allocation8 + $0x18c] ss:$16 sps:$4 sm:$0xff]  }
  0xaa   :  { %1829 = vmatpush2.bf16.msra.mxu0 %v2554_v54  ;;  %1872 = vmatpush2.bf16.msra.mxu1 %v2557_v55  ;;  %v2650_v54 = vld [vmem:[#allocation8 + $0x580] ss:$16 sps:$4 sm:$0xff]   ;;  %v2653_v55 = vld [vmem:[#allocation8 + $0x188] ss:$16 sps:$4 sm:$0xff]  }
  0xab   :  { %1830 = vmatprep.subr.bf16.mxu0 %v2562_v56  ;;  %1873 = vmatprep.subr.bf16.mxu1 %v2565_v57  ;;  %v2658_v56 = vld [vmem:[#allocation8 + $0x564] ss:$16 sps:$4 sm:$0xff]   ;;  %v2661_v57 = vld [vmem:[#allocation8 + $0x16c] ss:$16 sps:$4 sm:$0xff]  }
  0xae   :  { %1831 = vmatpush2.bf16.msra.mxu0 %v2560_v58  ;;  %1874 = vmatpush2.bf16.msra.mxu1 %v2563_v59  ;;  %v2656_v58 = vld [vmem:[#allocation8 + $0x560] ss:$16 sps:$4 sm:$0xff]   ;;  %v2659_v59 = vld [vmem:[#allocation8 + $0x168] ss:$16 sps:$4 sm:$0xff]  }
  0xaf   :  { %1832 = vmatprep.subr.bf16.mxu0 %v2568_v60  ;;  %1875 = vmatprep.subr.bf16.mxu1 %v2571_v61  ;;  %v2664_v60 = vld [vmem:[#allocation8 + $0x544] ss:$16 sps:$4 sm:$0xff]   ;;  %v2667_v61 = vld [vmem:[#allocation8 + $0x14c] ss:$16 sps:$4 sm:$0xff]  }
  0xb2   :  { %1833 = vmatpush2.bf16.msra.mxu0 %v2566_v62  ;;  %1876 = vmatpush2.bf16.msra.mxu1 %v2569_v63  ;;  %v2662_v62 = vld [vmem:[#allocation8 + $0x540] ss:$16 sps:$4 sm:$0xff]   ;;  %v2665_v63 = vld [vmem:[#allocation8 + $0x148] ss:$16 sps:$4 sm:$0xff]  }
  0xb3   :  { %1834 = vmatprep.subr.bf16.mxu0 %v2574_v0  ;;  %1877 = vmatprep.subr.bf16.mxu1 %v2577_v1  ;;  %v2670_v0 = vld [vmem:[#allocation8 + $0x524] ss:$16 sps:$4 sm:$0xff]   ;;  %v2673_v1 = vld [vmem:[#allocation8 + $0x12c] ss:$16 sps:$4 sm:$0xff]  }
  0xb6   :  { %1835 = vmatpush2.bf16.msra.mxu0 %v2572_v2  ;;  %1878 = vmatpush2.bf16.msra.mxu1 %v2575_v3  ;;  %v2668_v2 = vld [vmem:[#allocation8 + $0x520] ss:$16 sps:$4 sm:$0xff]   ;;  %v2671_v3 = vld [vmem:[#allocation8 + $0x128] ss:$16 sps:$4 sm:$0xff]  }
  0xb7   :  { %1890 = vmatprep.subr.bf16.mxu0 %v2586_v4  ;;  %1933 = vmatprep.subr.bf16.mxu1 %v2589_v5  ;;  %v2676_v4 = vld [vmem:[#allocation8 + $0x504] ss:$16 sps:$4 sm:$0xff]   ;;  %v2679_v5 = vld [vmem:[#allocation8 + $0x10c] ss:$16 sps:$4 sm:$0xff]  }
  0xb9   :  { %1837 = vmatmul.mubr.bf16.vlgmr.msra.gmra.mxu0 %v2981_v6  ;;  %1880 = vmatmul.mubr.bf16.vlgmr.msra.gmra.mxu1 %v2983_v7 }
  0xba   :  { %1891 = vmatpush1.bf16.msra.mxu0 %v2584_v8  ;;  %1934 = vmatpush1.bf16.msra.mxu1 %v2587_v9  ;;  %v2674_v8 = vld [vmem:[#allocation8 + $0x500] ss:$16 sps:$4 sm:$0xff]   ;;  %v2677_v9 = vld [vmem:[#allocation8 + $0x108] ss:$16 sps:$4 sm:$0xff]  }
  0xbb   :  { %1892 = vmatprep.subr.bf16.mxu0 %v2592_v10  ;;  %1935 = vmatprep.subr.bf16.mxu1 %v2595_v11  ;;  %v2685_v10 = vld [vmem:[#allocation8 + $0x2ec] ss:$16 sps:$4 sm:$0xff]  }
  0xbc   :  { %1965 = vmatprep.mubr.bf16.mxu1 %v2975_v31  ;;  %1922 = vmatprep.mubr.bf16.mxu0 %v2987_v16  ;;  %v2622_v31 = vld [vmem:[#allocation8 + $0x424] ss:$16 sps:$4 sm:$0xff]   ;;  %v2688_v11 = vld [vmem:[#allocation8 + $0x4ec] ss:$16 sps:$4 sm:$0xff]  }
  0xbe   :  { %1893 = vmatpush1.bf16.msra.mxu0 %v2590_v12  ;;  %1936 = vmatpush1.bf16.msra.mxu1 %v2593_v13  ;;  %v2991_v12 = vld [vmem:[#allocation5 + $0x10] ss:$24 sps:$4 sm:$0xff]  }
  0xbf   :  { %1894 = vmatprep.subr.bf16.mxu0 %v2598_v14  ;;  %1937 = vmatprep.subr.bf16.mxu1 %v2601_v15  ;;  %v2683_v13 = vld [vmem:[#allocation8 + $0x2e8] ss:$16 sps:$4 sm:$0xff]   ;;  %v2691_v15 = vld [vmem:[#allocation8 + $0x2cc] ss:$16 sps:$4 sm:$0xff]  }
  0xc0   :  { %v2686_v14 = vld [vmem:[#allocation8 + $0x4e8] ss:$16 sps:$4 sm:$0xff]  }
  0xc2   :  { %1895 = vmatpush1.bf16.msra.mxu0 %v2596_v17  ;;  %1938 = vmatpush1.bf16.msra.mxu1 %v2599_v18  ;;  %v2694_v17 = vld [vmem:[#allocation8 + $0x4cc] ss:$16 sps:$4 sm:$0xff]   ;;  %v2689_v18 = vld [vmem:[#allocation8 + $0x2c8] ss:$16 sps:$4 sm:$0xff]  }
  0xc3   :  { %1896 = vmatprep.subr.bf16.mxu0 %v2604_v19  ;;  %1939 = vmatprep.subr.bf16.mxu1 %v2607_v20  ;;  %v2692_v19 = vld [vmem:[#allocation8 + $0x4c8] ss:$16 sps:$4 sm:$0xff]   ;;  %v2697_v20 = vld [vmem:[#allocation8 + $0x2ac] ss:$16 sps:$4 sm:$0xff]  }
  0xc6   :  { %1897 = vmatpush1.bf16.msra.mxu0 %v2602_v21  ;;  %1940 = vmatpush1.bf16.msra.mxu1 %v2605_v22  ;;  %v2700_v21 = vld [vmem:[#allocation8 + $0x4ac] ss:$16 sps:$4 sm:$0xff]   ;;  %v2695_v22 = vld [vmem:[#allocation8 + $0x2a8] ss:$16 sps:$4 sm:$0xff]  }
  0xc7   :  { %1898 = vmatprep.subr.bf16.mxu0 %v2610_v23  ;;  %1941 = vmatprep.subr.bf16.mxu1 %v2613_v24  ;;  %v2698_v23 = vld [vmem:[#allocation8 + $0x4a8] ss:$16 sps:$4 sm:$0xff]   ;;  %v2703_v24 = vld [vmem:[#allocation8 + $0x28c] ss:$16 sps:$4 sm:$0xff]  }
  0xca   :  { %1899 = vmatpush1.bf16.msra.mxu0 %v2608_v25  ;;  %1942 = vmatpush1.bf16.msra.mxu1 %v2611_v26  ;;  %v2701_v25 = vld [vmem:[#allocation8 + $0x288] ss:$16 sps:$4 sm:$0xff]  }
  0xcb   :  { %1900 = vmatprep.subr.bf16.mxu0 %v2616_v27  ;;  %1943 = vmatprep.subr.bf16.mxu1 %v2619_v28  ;;  %v2704_v26 = vld [vmem:[#allocation8 + $0x488] ss:$16 sps:$4 sm:$0xff]   ;;  %v2709_v27 = vld [vmem:[#allocation8 + $0x26c] ss:$16 sps:$4 sm:$0xff]  }
  0xcc   :  { %v2712_v28 = vld [vmem:[#allocation8 + $0x46c] ss:$16 sps:$4 sm:$0xff]  }
  0xce   :  { %1901 = vmatpush1.bf16.msra.mxu0 %v2614_v29  ;;  %1944 = vmatpush1.bf16.msra.mxu1 %v2617_v30  ;;  %v2715_v29 = vld [vmem:[#allocation8 + $0x24c] ss:$16 sps:$4 sm:$0xff]  }
  0xcf   :  { %1902 = vmatprep.subr.bf16.mxu0 %v2622_v31  ;;  %1945 = vmatprep.subr.bf16.mxu1 %v2625_v32  ;;  %v2718_v30 = vld [vmem:[#allocation8 + $0x44c] ss:$16 sps:$4 sm:$0xff]   ;;  %v2713_v31 = vld [vmem:[#allocation8 + $0x248] ss:$16 sps:$4 sm:$0xff]  }
  0xd0   :  { %v2716_v32 = vld [vmem:[#allocation8 + $0x448] ss:$16 sps:$4 sm:$0xff]  }
  0xd2   :  { %1903 = vmatpush1.bf16.msra.mxu0 %v2620_v34  ;;  %1946 = vmatpush1.bf16.msra.mxu1 %v2623_v35  ;;  %v2721_v34 = vld [vmem:[#allocation8 + $0x22c] ss:$16 sps:$4 sm:$0xff]  }
  0xd3   :  { %1904 = vmatprep.subr.bf16.mxu0 %v2628_v36  ;;  %1947 = vmatprep.subr.bf16.mxu1 %v2631_v37  ;;  %v2724_v35 = vld [vmem:[#allocation8 + $0x42c] ss:$16 sps:$4 sm:$0xff]   ;;  %v2719_v36 = vld [vmem:[#allocation8 + $0x228] ss:$16 sps:$4 sm:$0xff]  }
  0xd4   :  { %v2722_v37 = vld [vmem:[#allocation8 + $0x428] ss:$16 sps:$4 sm:$0xff]  }
  0xd6   :  { %1905 = vmatpush1.bf16.msra.mxu0 %v2626_v38  ;;  %1948 = vmatpush1.bf16.msra.mxu1 %v2629_v39  ;;  %v2727_v38 = vld [vmem:[#allocation8 + $0x20c] ss:$16 sps:$4 sm:$0xff]  }
  0xd7   :  { %1906 = vmatprep.subr.bf16.mxu0 %v2634_v40  ;;  %1949 = vmatprep.subr.bf16.mxu1 %v2637_v41  ;;  %v2730_v39 = vld [vmem:[#allocation8 + $0x40c] ss:$16 sps:$4 sm:$0xff]   ;;  %v2725_v40 = vld [vmem:[#allocation8 + $0x208] ss:$16 sps:$4 sm:$0xff]  }
  0xd8   :  { %v2728_v41 = vld [vmem:[#allocation8 + $0x408] ss:$16 sps:$4 sm:$0xff]  }
  0xda   :  { %1907 = vmatpush2.bf16.msra.mxu0 %v2632_v42  ;;  %1950 = vmatpush2.bf16.msra.mxu1 %v2635_v43  ;;  %v2733_v42 = vld [vmem:[#allocation8 + $0x3ec] ss:$16 sps:$4 sm:$0xff]  }
  0xdb   :  { %1908 = vmatprep.subr.bf16.mxu0 %v2640_v44  ;;  %1951 = vmatprep.subr.bf16.mxu1 %v2643_v45  ;;  %v2736_v43 = vld [vmem:[#allocation8 + $0x5ec] ss:$16 sps:$4 sm:$0xff]   ;;  %v2731_v44 = vld [vmem:[#allocation8 + $0x3e8] ss:$16 sps:$4 sm:$0xff]  }
  0xdc   :  { %v2734_v45 = vld [vmem:[#allocation8 + $0x5e8] ss:$16 sps:$4 sm:$0xff]  }
  0xde   :  { %1909 = vmatpush2.bf16.msra.mxu0 %v2638_v46  ;;  %1952 = vmatpush2.bf16.msra.mxu1 %v2641_v47  ;;  %v2739_v46 = vld [vmem:[#allocation8 + $0x3cc] ss:$16 sps:$4 sm:$0xff]  }
  0xdf   :  { %1910 = vmatprep.subr.bf16.mxu0 %v2646_v48  ;;  %1953 = vmatprep.subr.bf16.mxu1 %v2649_v49  ;;  %v2742_v47 = vld [vmem:[#allocation8 + $0x5cc] ss:$16 sps:$4 sm:$0xff]   ;;  %v2737_v48 = vld [vmem:[#allocation8 + $0x3c8] ss:$16 sps:$4 sm:$0xff]  }
  0xe0   :  { %v2740_v49 = vld [vmem:[#allocation8 + $0x5c8] ss:$16 sps:$4 sm:$0xff]  }
  0xe2   :  { %1911 = vmatpush2.bf16.msra.mxu0 %v2644_v50  ;;  %1954 = vmatpush2.bf16.msra.mxu1 %v2647_v51  ;;  %v2745_v50 = vld [vmem:[#allocation8 + $0x3ac] ss:$16 sps:$4 sm:$0xff]  }
  0xe3   :  { %1912 = vmatprep.subr.bf16.mxu0 %v2652_v52  ;;  %1955 = vmatprep.subr.bf16.mxu1 %v2655_v53  ;;  %v2748_v51 = vld [vmem:[#allocation8 + $0x5ac] ss:$16 sps:$4 sm:$0xff]   ;;  %v2743_v52 = vld [vmem:[#allocation8 + $0x3a8] ss:$16 sps:$4 sm:$0xff]  }
  0xe4   :  { %v2746_v53 = vld [vmem:[#allocation8 + $0x5a8] ss:$16 sps:$4 sm:$0xff]  }
  0xe6   :  { %1913 = vmatpush2.bf16.msra.mxu0 %v2650_v54  ;;  %1956 = vmatpush2.bf16.msra.mxu1 %v2653_v55  ;;  %v2751_v54 = vld [vmem:[#allocation8 + $0x38c] ss:$16 sps:$4 sm:$0xff]  }
  0xe7   :  { %1914 = vmatprep.subr.bf16.mxu0 %v2658_v56  ;;  %1957 = vmatprep.subr.bf16.mxu1 %v2661_v57  ;;  %v2754_v55 = vld [vmem:[#allocation8 + $0x58c] ss:$16 sps:$4 sm:$0xff]   ;;  %v2749_v56 = vld [vmem:[#allocation8 + $0x388] ss:$16 sps:$4 sm:$0xff]  }
  0xe8   :  { %v2752_v57 = vld [vmem:[#allocation8 + $0x588] ss:$16 sps:$4 sm:$0xff]  }
  0xea   :  { %1915 = vmatpush2.bf16.msra.mxu0 %v2656_v58  ;;  %1958 = vmatpush2.bf16.msra.mxu1 %v2659_v59  ;;  %v2757_v58 = vld [vmem:[#allocation8 + $0x36c] ss:$16 sps:$4 sm:$0xff]  }
  0xeb   :  { %1916 = vmatprep.subr.bf16.mxu0 %v2664_v60  ;;  %1959 = vmatprep.subr.bf16.mxu1 %v2667_v61  ;;  %v2760_v59 = vld [vmem:[#allocation8 + $0x56c] ss:$16 sps:$4 sm:$0xff]   ;;  %v2755_v60 = vld [vmem:[#allocation8 + $0x368] ss:$16 sps:$4 sm:$0xff]  }
  0xec   :  { %v2758_v61 = vld [vmem:[#allocation8 + $0x568] ss:$16 sps:$4 sm:$0xff]  }
  0xee   :  { %1917 = vmatpush2.bf16.msra.mxu0 %v2662_v62  ;;  %1960 = vmatpush2.bf16.msra.mxu1 %v2665_v63  ;;  %v2763_v62 = vld [vmem:[#allocation8 + $0x34c] ss:$16 sps:$4 sm:$0xff]  }
  0xef   :  { %1918 = vmatprep.subr.bf16.mxu0 %v2670_v0  ;;  %1961 = vmatprep.subr.bf16.mxu1 %v2673_v1  ;;  %v2766_v63 = vld [vmem:[#allocation8 + $0x54c] ss:$16 sps:$4 sm:$0xff]   ;;  %v2761_v0 = vld [vmem:[#allocation8 + $0x348] ss:$16 sps:$4 sm:$0xff]  }
  0xf0   :  { %v2764_v1 = vld [vmem:[#allocation8 + $0x548] ss:$16 sps:$4 sm:$0xff]  }
  0xf2   :  { %1919 = vmatpush2.bf16.msra.mxu0 %v2668_v2  ;;  %1962 = vmatpush2.bf16.msra.mxu1 %v2671_v3  ;;  %v150_v2 = vlaneseq  ;;  %v2769_v3 = vld [vmem:[#allocation8 + $0x32c] ss:$16 sps:$4 sm:$0xff]  }
  0xf3   :  { %1920 = vmatprep.subr.bf16.mxu0 %v2676_v4  ;;  %1963 = vmatprep.subr.bf16.mxu1 %v2679_v5  ;;  %v2772_v4 = vld [vmem:[#allocation8 + $0x52c] ss:$16 sps:$4 sm:$0xff]   ;;  %v2767_v5 = vld [vmem:[#allocation8 + $0x328] ss:$16 sps:$4 sm:$0xff]  }
  0xf6   :  { %1921 = vmatpush2.bf16.msra.mxu0 %v2674_v8  ;;  %1964 = vmatpush2.bf16.msra.mxu1 %v2677_v9  ;;  %v2770_v8 = vld [vmem:[#allocation8 + $0x528] ss:$16 sps:$4 sm:$0xff]   ;;  %v2997_v9 = vshrl.u32 %v150_v2, 7 }
  0xf7   :  { %1976 = vmatprep.subr.bf16.mxu0 %v2685_v10  ;;  %2019 = vmatprep.subr.bf16.mxu1 %v2688_v11  ;;  %v2775_v10 = vld [vmem:[#allocation8 + $0x30c] ss:$16 sps:$4 sm:$0xff]  }
  0xf8   :  { %v2778_v11 = vld [vmem:[#allocation8 + $0x50c] ss:$16 sps:$4 sm:$0xff]  }
  0xf9   :  { %1923 = vmatmul.mubr.bf16.vlgmr.msra.gmra.mxu0 %v2991_v12  ;;  %1966 = vmatmul.mubr.bf16.vlgmr.msra.gmra.mxu1 %v2981_v6  ;;  %v2706_v6 = vld [vmem:[#allocation8 + $0x48c] ss:$16 sps:$4 sm:$0xff]  }
  0xfa   :  { %1977 = vmatpush1.bf16.msra.mxu0 %v2683_v13  ;;  %2020 = vmatpush1.bf16.msra.mxu1 %v2686_v14  ;;  %v2773_v13 = vld [vmem:[#allocation8 + $0x308] ss:$16 sps:$4 sm:$0xff]  }
  0xfb   :  { %1978 = vmatprep.subr.bf16.mxu0 %v2691_v15  ;;  %2021 = vmatprep.subr.bf16.mxu1 %v2694_v17  ;;  %v2776_v14 = vld [vmem:[#allocation8 + $0x508] ss:$16 sps:$4 sm:$0xff]   ;;  %v152_v15 = vsub.s32 0, %v2997_v9  ;;  %v160_v17 = vsub.s32 2, %v2997_v9 }
  0xfc   :  { %2008 = vmatprep.mubr.bf16.mxu0 %v2977_v33  ;;  %2051 = vmatprep.mubr.bf16.mxu1 %v2987_v16  ;;  %v2707_v33 = vld [vmem:[#allocation8 + $0x268] ss:$16 sps:$4 sm:$0xff]  }
  0xfd   :  { %v2710_v16 = vld [vmem:[#allocation8 + $0x468] ss:$16 sps:$4 sm:$0xff]  }
  0xfe   :  { %1979 = vmatpush1.bf16.msra.mxu0 %v2689_v18  ;;  %2022 = vmatpush1.bf16.msra.mxu1 %v2692_v19  ;;  %v148_v18 = vld [vmem:[%s3034_s3] sm:$0xf]  ;;  %v156_v19 = vsub.s32 1, %v2997_v9  ;;  %s2919_s3 = smov [#allocation10]  }
  0xff   :  { %1980 = vmatprep.subr.bf16.mxu0 %v2697_v20  ;;  %2023 = vmatprep.subr.bf16.mxu1 %v2700_v21  ;;  %v164_v20 = vsub.s32 3, %v2997_v9  ;;  %v153_v21 = vrot.slane %v148_v18, %v152_v15  ;;  %s2075_s25 = sshll.u32 %s2919_s3, 4  ;;  %s2076_s25 = int_to_ptr.vmem [resolvable:$true] %s2075_s25 }
 0x100   :  { %s2859_s26 = scalar_lea.vmem %s2076_s25, 1024  ;;  %p2864_p7 = scmp.lt.s32.totalorder %s2076_s25, %s2076_s25 }
 0x101   :  { %p2860_p6 = scmp.ne.s32.totalorder %s2076_s25, %s2859_s26  ;;  %p2865_p8 = scmp.lt.s32.totalorder %s2859_s26, %s2859_s26 }
 0x102   :  { %1981 = vmatpush1.bf16.msra.mxu0 %v2695_v22  ;;  %2024 = vmatpush1.bf16.msra.mxu1 %v2698_v23  ;;  %v161_v22 = vrot.slane %v148_v18, %v160_v17  ;;  %v157_v23 = vrot.slane %v148_v18, %v156_v19 }
 0x103   :  { %1982 = vmatprep.subr.bf16.mxu0 %v2703_v24  ;;  %2025 = vmatprep.subr.bf16.mxu1 %v2706_v6  ;;  %v165_v24 = vrot.slane %v148_v18, %v164_v20  ;;  %p2866_p9 = por %p2865_p8, %p2864_p7 }
 0x105   :  { %p2867_p10 = pnand %p2866_p9, %p2860_p6 }
 0x106   :  { %1983 = vmatpush1.bf16.msra.mxu0 %v2701_v25  ;;  %2026 = vmatpush1.bf16.msra.mxu1 %v2704_v26 }
 0x107   :  { %1984 = vmatprep.subr.bf16.mxu0 %v2709_v27  ;;  %2027 = vmatprep.subr.bf16.mxu1 %v2712_v28 }
 0x10a   :  { %1985 = vmatpush1.bf16.msra.mxu0 %v2707_v33  ;;  %2028 = vmatpush1.bf16.msra.mxu1 %v2710_v16 }
 0x10b   :  { %1986 = vmatprep.subr.bf16.mxu0 %v2715_v29  ;;  %2029 = vmatprep.subr.bf16.mxu1 %v2718_v30 }
 0x10e   :  { %1987 = vmatpush1.bf16.msra.mxu0 %v2713_v31  ;;  %2030 = vmatpush1.bf16.msra.mxu1 %v2716_v32 }
 0x10f   :  { %1988 = vmatprep.subr.bf16.mxu0 %v2721_v34  ;;  %2031 = vmatprep.subr.bf16.mxu1 %v2724_v35 }
 0x112   :  { %1989 = vmatpush1.bf16.msra.mxu0 %v2719_v36  ;;  %2032 = vmatpush1.bf16.msra.mxu1 %v2722_v37 }
 0x113   :  { %1990 = vmatprep.subr.bf16.mxu0 %v2727_v38  ;;  %2033 = vmatprep.subr.bf16.mxu1 %v2730_v39 }
 0x116   :  { %1991 = vmatpush1.bf16.msra.mxu0 %v2725_v40  ;;  %2034 = vmatpush1.bf16.msra.mxu1 %v2728_v41 }
 0x117   :  { %1992 = vmatprep.subr.bf16.mxu0 %v2733_v42  ;;  %2035 = vmatprep.subr.bf16.mxu1 %v2736_v43 }
 0x11a   :  { %1993 = vmatpush2.bf16.msra.mxu0 %v2731_v44  ;;  %2036 = vmatpush2.bf16.msra.mxu1 %v2734_v45 }
 0x11b   :  { %1994 = vmatprep.subr.bf16.mxu0 %v2739_v46  ;;  %2037 = vmatprep.subr.bf16.mxu1 %v2742_v47 }
 0x11e   :  { %1995 = vmatpush2.bf16.msra.mxu0 %v2737_v48  ;;  %2038 = vmatpush2.bf16.msra.mxu1 %v2740_v49 }
 0x11f   :  { %1996 = vmatprep.subr.bf16.mxu0 %v2745_v50  ;;  %2039 = vmatprep.subr.bf16.mxu1 %v2748_v51 }
 0x122   :  { %1997 = vmatpush2.bf16.msra.mxu0 %v2743_v52  ;;  %2040 = vmatpush2.bf16.msra.mxu1 %v2746_v53 }
 0x123   :  { %1998 = vmatprep.subr.bf16.mxu0 %v2751_v54  ;;  %2041 = vmatprep.subr.bf16.mxu1 %v2754_v55 }
 0x126   :  { %1999 = vmatpush2.bf16.msra.mxu0 %v2749_v56  ;;  %2042 = vmatpush2.bf16.msra.mxu1 %v2752_v57 }
 0x127   :  { %2000 = vmatprep.subr.bf16.mxu0 %v2757_v58  ;;  %2043 = vmatprep.subr.bf16.mxu1 %v2760_v59 }
 0x12a   :  { %2001 = vmatpush2.bf16.msra.mxu0 %v2755_v60  ;;  %2044 = vmatpush2.bf16.msra.mxu1 %v2758_v61 }
 0x12b   :  { %2002 = vmatprep.subr.bf16.mxu0 %v2763_v62  ;;  %2045 = vmatprep.subr.bf16.mxu1 %v2766_v63 }
 0x12e   :  { %2003 = vmatpush2.bf16.msra.mxu0 %v2761_v0  ;;  %2046 = vmatpush2.bf16.msra.mxu1 %v2764_v1 }
 0x12f   :  { %2004 = vmatprep.subr.bf16.mxu0 %v2769_v3  ;;  %2047 = vmatprep.subr.bf16.mxu1 %v2772_v4 }
 0x132   :  { %2005 = vmatpush2.bf16.msra.mxu0 %v2767_v5  ;;  %2048 = vmatpush2.bf16.msra.mxu1 %v2770_v8 }
 0x133   :  { %2006 = vmatprep.subr.bf16.mxu0 %v2775_v10  ;;  %2049 = vmatprep.subr.bf16.mxu1 %v2778_v11 }
 0x136   :  { %2007 = vmatpush2.bf16.msra.mxu0 %v2773_v13  ;;  %2050 = vmatpush2.bf16.msra.mxu1 %v2776_v14 }
 0x139   :  { %v534_v6 = vpop.f32.mrf.mxu0  ;;  %v577_v25 = vpop.f32.mrf.mxu1  ;;  %2009 = vmatmul.mubr.bf16.vlgmr.msra.gmra.mxu0 %v2983_v7  ;;  %2052 = vmatmul.mubr.bf16.vlgmr.msra.gmra.mxu1 %v2991_v12 }
 0x13a   :  { %v535_v26 = vadd.f32 %v534_v6, %v153_v21  ;;  %v578_v27 = vadd.f32 %v577_v25, %v161_v22 }
 0x13b   :  { %v536_v28 = vpop.f32.mrf.mxu0  ;;  %v579_v33 = vpop.f32.mrf.mxu1 }
 0x13c   :  { %586 = vst [vmem:[#allocation10] sm:$0xff] %v535_v26  ;;  %588 = vst [vmem:[#allocation10 + $0x10] sm:$0xff] %v578_v27  ;;  %v537_v16 = vadd.f32 %v536_v28, %v157_v23  ;;  %v580_v29 = vadd.f32 %v579_v33, %v165_v24 }
 0x13d   :  { %v538_v30 = vpop.f32.mrf.mxu0  ;;  %v581_v31 = vpop.f32.mrf.mxu1 }
 0x13e   :  { %587 = vst [vmem:[#allocation10 + $0x8] sm:$0xff] %v537_v16  ;;  %589 = vst [vmem:[#allocation10 + $0x18] sm:$0xff] %v580_v29  ;;  %v539_v32 = vadd.f32 %v538_v30, %v153_v21  ;;  %v582_v34 = vadd.f32 %v581_v31, %v161_v22 }
 0x13f   :  { %v540_v35 = vpop.f32.mrf.mxu0  ;;  %v583_v36 = vpop.f32.mrf.mxu1 }
 0x140   :  { %590 = vst [vmem:[#allocation10 + $0x20] sm:$0xff] %v539_v32  ;;  %592 = vst [vmem:[#allocation10 + $0x30] sm:$0xff] %v582_v34  ;;  %v541_v7 = vadd.f32 %v540_v35, %v157_v23  ;;  %v584_v12 = vadd.f32 %v583_v36, %v165_v24 }
 0x142   :  { %591 = vst [vmem:[#allocation10 + $0x28] sm:$0xff] %v541_v7  ;;  %593 = vst [vmem:[#allocation10 + $0x38] sm:$0xff] %v584_v12 }
 0x143   :  { %2870 = shalt.err (!%p2867_p10)
}
 0x144   :  { %s2920_s27 = smov 512   ;;  %s2921_s28 = smov 32   ;;  %v792_v38 = vld [vmem:[%s3036_s5] sm:$0xf] }
 0x145   :  { %2081 = dma.vmem_to_hbm [thread:$0]  %s2076_s25, 1024, %s3037_s6, [#allocation4], %s2920_s27, %s2920_s27, %s2921_s28   ;;  %v797_v40 = vrot.slane %v792_v38, %v152_v15  ;;  %v801_v42 = vrot.slane %v792_v38, %v156_v19  ;;  %v805_v3 = vrot.slane %v792_v38, %v160_v17  ;;  %v809_v4 = vrot.slane %v792_v38, %v164_v20 }
 0x146   :  { %s2922_s5 = smov [#allocation11]  }
 0x147   :  { %s2087_s6 = sshll.u32 %s2922_s5, 4  ;;  %s2088_s6 = int_to_ptr.vmem [resolvable:$true] %s2087_s6 }
 0x148   :  { %s2879_s10 = scalar_lea.vmem %s2088_s6, 1024  ;;  %p2884_p12 = scmp.lt.s32.totalorder %s2088_s6, %s2088_s6 }
 0x149   :  { %p2880_p11 = scmp.ne.s32.totalorder %s2088_s6, %s2879_s10  ;;  %p2885_p13 = scmp.lt.s32.totalorder %s2879_s10, %s2879_s10 }
 0x14b   :  { %p2886_p0 = por %p2885_p13, %p2884_p12 }
 0x14d   :  { %p2887_p1 = pnand %p2886_p0, %p2880_p11 }
 0x179   :  { %v1838_v37 = vpop.f32.mrf.mxu0  ;;  %v1881_v41 = vpop.f32.mrf.mxu1 }
 0x17a   :  { %v1839_v44 = vadd.f32 %v1838_v37, %v797_v40 }
 0x17b   :  { %v1840_v39 = vpop.f32.mrf.mxu0  ;;  %v1883_v45 = vpop.f32.mrf.mxu1 }
 0x17c   :  { %v1841_v46 = vadd.f32 %v1840_v39, %v801_v42  ;;  %v1882_v48 = vadd.f32 %v1881_v41, %v1839_v44 }
 0x17d   :  { %v1842_v43 = vpop.f32.mrf.mxu0  ;;  %v1885_v50 = vpop.f32.mrf.mxu1 }
 0x17e   :  { %v1843_v49 = vadd.f32 %v1842_v43, %v797_v40  ;;  %v1884_v52 = vadd.f32 %v1883_v45, %v1841_v46 }
 0x17f   :  { %v1844_v47 = vpop.f32.mrf.mxu0  ;;  %v1887_v58 = vpop.f32.mrf.mxu1 }
 0x180   :  { %v1845_v53 = vadd.f32 %v1844_v47, %v801_v42  ;;  %v1886_v56 = vadd.f32 %v1885_v50, %v1843_v49 }
 0x182   :  { %v1888_v60 = vadd.f32 %v1887_v58, %v1845_v53 }
 0x1b9   :  { %v1924_v51 = vpop.f32.mrf.mxu0  ;;  %v1967_v0 = vpop.f32.mrf.mxu1 }
 0x1ba   :  { %v1925_v54 = vadd.f32 %v1924_v51, %v1882_v48  ;;  %v1968_v8 = vadd.f32 %v1967_v0, %v805_v3 }
 0x1bb   :  { %v1926_v55 = vpop.f32.mrf.mxu0  ;;  %v1969_v1 = vpop.f32.mrf.mxu1 }
 0x1bc   :  { %2062 = vst [vmem:[#allocation11] sm:$0xff] %v1925_v54  ;;  %v1927_v57 = vadd.f32 %v1926_v55, %v1884_v52  ;;  %v1970_v13 = vadd.f32 %v1969_v1, %v809_v4 }
 0x1bd   :  { %v1928_v59 = vpop.f32.mrf.mxu0  ;;  %v1971_v2 = vpop.f32.mrf.mxu1 }
 0x1be   :  { %2063 = vst [vmem:[#allocation11 + $0x8] sm:$0xff] %v1927_v57  ;;  %v1929_v61 = vadd.f32 %v1928_v59, %v1886_v56  ;;  %v1972_v19 = vadd.f32 %v1971_v2, %v805_v3 }
 0x1bf   :  { %v1930_v62 = vpop.f32.mrf.mxu0  ;;  %v1973_v5 = vpop.f32.mrf.mxu1 }
 0x1c0   :  { %2066 = vst [vmem:[#allocation11 + $0x20] sm:$0xff] %v1929_v61  ;;  %v1931_v63 = vadd.f32 %v1930_v62, %v1888_v60  ;;  %v1974_v6 = vadd.f32 %v1973_v5, %v809_v4 }
 0x1c2   :  { %2067 = vst [vmem:[#allocation11 + $0x28] sm:$0xff] %v1931_v63 }
 0x1f9   :  { %v2010_v10 = vpop.f32.mrf.mxu0  ;;  %v2053_v11 = vpop.f32.mrf.mxu1 }
 0x1fa   :  { %v2011_v14 = vadd.f32 %v2010_v10, %v1968_v8 }
 0x1fb   :  { %v2012_v15 = vpop.f32.mrf.mxu0  ;;  %v2055_v18 = vpop.f32.mrf.mxu1 }
 0x1fc   :  { %v2054_v21 = vadd.f32 %v2053_v11, %v2011_v14  ;;  %v2013_v22 = vadd.f32 %v2012_v15, %v1970_v13 }
 0x1fd   :  { %v2014_v23 = vpop.f32.mrf.mxu0  ;;  %v2057_v24 = vpop.f32.mrf.mxu1 }
 0x1fe   :  { %2064 = vst [vmem:[#allocation11 + $0x10] sm:$0xff] %v2054_v21  ;;  %v2056_v25 = vadd.f32 %v2055_v18, %v2013_v22  ;;  %v2015_v17 = vadd.f32 %v2014_v23, %v1972_v19 }
 0x1ff   :  { %v2016_v26 = vpop.f32.mrf.mxu0  ;;  %v2059_v27 = vpop.f32.mrf.mxu1 }
 0x200   :  { %2065 = vst [vmem:[#allocation11 + $0x18] sm:$0xff] %v2056_v25  ;;  %v2058_v9 = vadd.f32 %v2057_v24, %v2015_v17  ;;  %v2017_v20 = vadd.f32 %v2016_v26, %v1974_v6 }
 0x202   :  { %2068 = vst [vmem:[#allocation11 + $0x30] sm:$0xff] %v2058_v9  ;;  %v2060_v28 = vadd.f32 %v2059_v27, %v2017_v20 }
 0x204   :  { %2069 = vst [vmem:[#allocation11 + $0x38] sm:$0xff] %v2060_v28 }
 0x205   :  { %2890 = shalt.err (!%p2887_p1)
}
 0x206   :  { %2093 = dma.vmem_to_hbm [thread:$0]  %s2088_s6, 1024, %s3038_s7, [#allocation12], %s2920_s27, %s2920_s27, %s2921_s28  }
 0x207   :  { %2905 = dma.done.wait [#allocation4], 1024  }
 0x208   :  { %2906 = vsyncadd [#allocation4], 4294966272 }
 0x209   :  { %2907 = dma.done.wait [#allocation12], 1024  }
 0x20a   :  { %2908 = vsyncadd [#allocation12], 4294966272 }
 0x20b   :  { %2100 = vsyncpa [#allocation3], 1 }
 0x20c   :  { %2101 = vsyncpa [#allocation6], 1 }
 0x20d   :  { %2102 = vsyncpa [#allocation9], 1 }
 0x20e   :  { %2103 = vsyncpa [#allocation4], 1 }
 0x20f   :  { %2104 = vsyncpa [#allocation12], 1 }

</bundles_post_ra>
